<compile_context>
chip_gen: v6e
topology: v6e:2x2x1
jax: 0.10.0
libtpu: 0.0.40
codegen_flags: <defaults>
</compile_context>

<pallas_src>
import jax
import jax.numpy as jnp
from jax.experimental import pallas as pl
from jax.experimental.pallas import tpu as pltpu

IGNORE_LB = 255

_K1_ROWS_CAP = 128   # 128 rows * 128 lanes = 16384 pixels / grid step (kernel 1)
_K2_ROWS_CAP = 512   # 65536 pixels / grid step (kernel 2, only 8 B/pixel)


def _choose_rows(q, cap):
    """Pick a rows-of-128-lanes tile that divides q.

    Must be a multiple of 8 (sublane constraint) unless it equals q (a block
    dim equal to the full array dim is always allowed)."""
    if q <= cap:
        return q
    for r in range(cap - cap % 8, 7, -8):
        if q % r == 0:
            return r
    # TODO(synk): pad the pixel axis instead of falling back to a full-image block.
    return q


def _pick_nll_kernel(logits_ref, labels_ref, picks_ref, nll_ref):
    # logits_ref: (1, C, R, 128); labels_ref/picks_ref/nll_ref: (1, R, 128)
    x = logits_ref[0].astype(jnp.float32)                     # (C, R, 128)
    lbl = labels_ref[0]                                       # (R, 128) int32
    invalid = lbl == IGNORE_LB
    lbl0 = jnp.where(invalid, 0, lbl)                         # labels[invalid] = 0
    m = jnp.max(x, axis=0)                                    # (R, 128)
    lse = m + jnp.log(jnp.sum(jnp.exp(x - m), axis=0))        # (R, 128)
    cls = jax.lax.broadcasted_iota(jnp.int32, x.shape, 0)     # class index per sublane-slab
    logit_at_label = jnp.sum(jnp.where(cls == lbl0, x, 0.0), axis=0)
    pick = jnp.exp(logit_at_label - lse)                      # softmax prob at label
    picks_ref[0] = jnp.where(invalid, 1.0, pick)              # picks[invalid] = 1
    nll_ref[0] = lse - logit_at_label                         # -log softmax at label


def _masked_sum_kernel(t_ref, picks_ref, nll_ref, sum_ref, cnt_ref):
    # t_ref: SMEM (1,) f32 via scalar prefetch.
    # picks/nll blocks: (1, R, 128); sum/cnt outputs are per-image (1, R, 128)
    # partials, VMEM-resident across the reduction axis.
    @pl.when(pl.program_id(1) == 0)
    def _():
        sum_ref[...] = jnp.zeros_like(sum_ref)
        cnt_ref[...] = jnp.zeros_like(cnt_ref)

    t = t_ref[0]
    keep = picks_ref[0] <= t                                  # labels[picks > t] -> ignore
    sum_ref[0] += jnp.where(keep, nll_ref[0], 0.0)
    cnt_ref[0] += keep.astype(jnp.float32)


def ohem_ce_loss(logits, labels, thresh, n_min, ignore_lb=255):
    assert ignore_lb == IGNORE_LB
    N, C, H, W = logits.shape
    HW = H * W
    # TODO(synk): pad the pixel axis with ignore pixels when H*W % 128 != 0.
    assert HW % 128 == 0, "H*W must be a multiple of 128"
    Q = HW // 128
    P = N * HW

    lg = logits.reshape(N, C, Q, 128)                 # free view of NCHW, native dtype
    lb = labels.reshape(N, Q, 128).astype(jnp.int32)  # lane-dense labels

    # ---- Kernel 1: per-pixel pick probability + NLL -------------------------
    r1 = _choose_rows(Q, _K1_ROWS_CAP)
    picks, nll = pl.pallas_call(
        _pick_nll_kernel,
        out_shape=(jax.ShapeDtypeStruct((N, Q, 128), jnp.float32),
                   jax.ShapeDtypeStruct((N, Q, 128), jnp.float32)),
        grid_spec=pltpu.PrefetchScalarGridSpec(
            num_scalar_prefetch=0,
            grid=(N, Q // r1),
            in_specs=[pl.BlockSpec((1, C, r1, 128), lambda n, j: (n, 0, j, 0)),
                      pl.BlockSpec((1, r1, 128), lambda n, j: (n, j, 0))],
            out_specs=[pl.BlockSpec((1, r1, 128), lambda n, j: (n, j, 0)),
                       pl.BlockSpec((1, r1, 128), lambda n, j: (n, j, 0))],
        ),
        compiler_params=pltpu.CompilerParams(
            dimension_semantics=("parallel", "parallel")),
    )(lg, lb)

    # ---- n_min-th smallest pick via top-k selection (no full sort) ----------
    # TODO(synk): for very large n_min a histogram/bucket selection over [0,1]
    # (fusable into kernel 1's epilogue) would beat top_k as well.
    picks_flat = picks.reshape(P)
    nth_smallest = -jax.lax.top_k(-picks_flat, n_min + 1)[0][n_min]
    t = jnp.maximum(nth_smallest, jnp.float32(thresh)).reshape(1)

    # ---- Kernel 2: OHEM-masked sum / count ----------------------------------
    r2 = _choose_rows(Q, _K2_ROWS_CAP)
    loss_part, cnt_part = pl.pallas_call(
        _masked_sum_kernel,
        out_shape=(jax.ShapeDtypeStruct((N, r2, 128), jnp.float32),
                   jax.ShapeDtypeStruct((N, r2, 128), jnp.float32)),
        grid_spec=pltpu.PrefetchScalarGridSpec(
            num_scalar_prefetch=1,   # threshold -> SMEM scalar (no (1,1) VMEM block)
            grid=(N, Q // r2),
            in_specs=[pl.BlockSpec((1, r2, 128), lambda n, j, t: (n, j, 0)),
                      pl.BlockSpec((1, r2, 128), lambda n, j, t: (n, j, 0))],
            out_specs=[pl.BlockSpec((1, r2, 128), lambda n, j, t: (n, 0, 0)),
                       pl.BlockSpec((1, r2, 128), lambda n, j, t: (n, 0, 0))],
        ),
        compiler_params=pltpu.CompilerParams(
            dimension_semantics=("parallel", "arbitrary")),
    )(t, picks, nll)

    return jnp.sum(loss_part) / jnp.sum(cnt_part)


def _ref_ohem(logits, labels, thresh, n_min, ignore=255):
    # Pure-JAX reference replicating the PyTorch forward semantics.
    N, C, H, W = logits.shape
    lg = jnp.transpose(logits, (0, 2, 3, 1)).reshape(-1, C).astype(jnp.float32)
    lb = labels.reshape(-1)
    invalid = lb == ignore
    lb0 = jnp.where(invalid, 0, lb)
    logp = jax.nn.log_softmax(lg, axis=1)
    idx = jnp.arange(lg.shape[0])
    picks = jnp.where(invalid, 1.0, jnp.exp(logp[idx, lb0]))
    t = jnp.maximum(jnp.sort(picks)[n_min], jnp.float32(thresh))
    keep = picks <= t
    nll = -logp[idx, lb0]
    return jnp.sum(jnp.where(keep, nll, 0.0)) / jnp.sum(keep)


if __name__ == "__main__":
    key = jax.random.PRNGKey(0)
    k1, k2, k3 = jax.random.split(key, 3)

    N, C, H, W = 2, 4, 16, 16
    thresh = 0.7
    n_min = 64  # n_min < N*H*W

    logits = jax.random.normal(k1, (N, C, H, W), dtype=jnp.float32)
    labels = jax.random.randint(k2, (N, H, W), 0, C, dtype=jnp.int32)
    # sprinkle some ignore_lb pixels
    ignore_mask = jax.random.uniform(k3, (N, H, W)) < 0.1
    labels = jnp.where(ignore_mask, IGNORE_LB, labels)

    loss = ohem_ce_loss(logits, labels, thresh, n_min)
    loss = jax.block_until_ready(loss)

    ref = jax.block_until_ready(_ref_ohem(logits, labels, thresh, n_min))
    assert jnp.isfinite(loss), "loss is not finite"
    assert jnp.allclose(loss, ref, rtol=1e-4, atol=1e-5), (loss, ref)
    print("KERNEL_OK")
</pallas_src>

<mosaic_0001>
module attributes {stable_mosaic.version = 11 : i64} {
  func.func @_pick_nll_kernel(%arg0: i32, %arg1: i32, %arg2: memref<1x4x2x128xf32, #tpu.memory_space<vmem>>, %arg3: memref<1x2x128xi32, #tpu.memory_space<vmem>>, %arg4: memref<1x2x128xf32, #tpu.memory_space<vmem>>, %arg5: memref<1x2x128xf32, #tpu.memory_space<vmem>>) attributes {dimension_semantics = [#tpu.dimension_semantics<parallel>, #tpu.dimension_semantics<parallel>], iteration_bounds = array<i64: 2, 1>, scalar_prefetch = 0 : i64, scratch_operands = 0 : i64, tpu.core_type = #tpu.core_type<tc>, window_params = [{transform_indices = @transform_0, window_bounds = array<i64: 1, 4, 2, 128>}, {transform_indices = @transform_1, window_bounds = array<i64: 1, 2, 128>}, {transform_indices = @transform_2, window_bounds = array<i64: 1, 2, 128>}, {transform_indices = @transform_3, window_bounds = array<i64: 1, 2, 128>}]} {
    %c0 = arith.constant 0 : index
    %c0_0 = arith.constant 0 : index
    %c0_1 = arith.constant 0 : index
    %c0_2 = arith.constant 0 : index
    %0 = vector.load %arg2[%c0, %c0_0, %c0_1, %c0_2] : memref<1x4x2x128xf32, #tpu.memory_space<vmem>>, vector<1x4x2x128xf32>
    %1 = vector.shape_cast %0 : vector<1x4x2x128xf32> to vector<4x2x128xf32>
    %c0_3 = arith.constant 0 : index
    %c0_4 = arith.constant 0 : index
    %c0_5 = arith.constant 0 : index
    %2 = vector.load %arg3[%c0_3, %c0_4, %c0_5] : memref<1x2x128xi32, #tpu.memory_space<vmem>>, vector<1x2x128xi32>
    %3 = vector.shape_cast %2 : vector<1x2x128xi32> to vector<2x128xi32>
    %c255_i32 = arith.constant 255 : i32
    %4 = vector.broadcast %c255_i32 : i32 to vector<2x128xi32>
    %5 = arith.cmpi eq, %3, %4 : vector<2x128xi32>
    %c0_i32 = arith.constant 0 : i32
    %6 = vector.broadcast %c0_i32 : i32 to vector<2x128xi32>
    %7 = arith.select %5, %6, %3 : vector<2x128xi1>, vector<2x128xi32>
    %cst = arith.constant dense<0xFF800000> : vector<2x128xf32>
    %8 = vector.multi_reduction <maximumf>, %1, %cst [0] : vector<4x2x128xf32> to vector<2x128xf32>
    %9 = vector.shape_cast %8 : vector<2x128xf32> to vector<1x2x128xf32>
    %10 = vector.broadcast %9 : vector<1x2x128xf32> to vector<4x2x128xf32>
    %11 = arith.subf %1, %10 : vector<4x2x128xf32>
    %12 = math.exp %11 : vector<4x2x128xf32>
    %cst_6 = arith.constant dense<0.000000e+00> : vector<2x128xf32>
    %13 = vector.multi_reduction <add>, %12, %cst_6 [0] : vector<4x2x128xf32> to vector<2x128xf32>
    %14 = math.log %13 : vector<2x128xf32>
    %15 = arith.addf %8, %14 : vector<2x128xf32>
    %16 = tpu.iota {dimensions = array<i32: 0>} : vector<4x2x128xi32>
    %17 = vector.shape_cast %7 : vector<2x128xi32> to vector<1x2x128xi32>
    %18 = vector.broadcast %17 : vector<1x2x128xi32> to vector<4x2x128xi32>
    %19 = arith.cmpi eq, %16, %18 : vector<4x2x128xi32>
    %cst_7 = arith.constant 0.000000e+00 : f32
    %20 = vector.broadcast %cst_7 : f32 to vector<4x2x128xf32>
    %21 = arith.select %19, %1, %20 : vector<4x2x128xi1>, vector<4x2x128xf32>
    %cst_8 = arith.constant dense<0.000000e+00> : vector<2x128xf32>
    %22 = vector.multi_reduction <add>, %21, %cst_8 [0] : vector<4x2x128xf32> to vector<2x128xf32>
    %23 = arith.subf %22, %15 : vector<2x128xf32>
    %24 = math.exp %23 : vector<2x128xf32>
    %cst_9 = arith.constant 1.000000e+00 : f32
    %25 = vector.broadcast %cst_9 : f32 to vector<2x128xf32>
    %26 = arith.select %5, %25, %24 : vector<2x128xi1>, vector<2x128xf32>
    %c0_10 = arith.constant 0 : index
    %c0_11 = arith.constant 0 : index
    %c0_12 = arith.constant 0 : index
    %27 = vector.load %arg4[%c0_10, %c0_11, %c0_12] : memref<1x2x128xf32, #tpu.memory_space<vmem>>, vector<1x2x128xf32>
    %28 = vector.shape_cast %27 : vector<1x2x128xf32> to vector<2x128xf32>
    %29 = vector.shape_cast %26 : vector<2x128xf32> to vector<1x2x128xf32>
    tpu.vector_store %arg4[%c0_10, %c0_11, %c0_12], %29 {strides = array<i32>} : memref<1x2x128xf32, #tpu.memory_space<vmem>>, vector<1x2x128xf32>,
    %30 = arith.subf %15, %22 : vector<2x128xf32>
    %c0_13 = arith.constant 0 : index
    %c0_14 = arith.constant 0 : index
    %c0_15 = arith.constant 0 : index
    %31 = vector.load %arg5[%c0_13, %c0_14, %c0_15] : memref<1x2x128xf32, #tpu.memory_space<vmem>>, vector<1x2x128xf32>
    %32 = vector.shape_cast %31 : vector<1x2x128xf32> to vector<2x128xf32>
    %33 = vector.shape_cast %30 : vector<2x128xf32> to vector<1x2x128xf32>
    tpu.vector_store %arg5[%c0_13, %c0_14, %c0_15], %33 {strides = array<i32>} : memref<1x2x128xf32, #tpu.memory_space<vmem>>, vector<1x2x128xf32>,
    return
  }
  func.func @transform_0(%arg0: i32, %arg1: i32) -> (i32, i32, i32, i32) {
    %c0_i32 = arith.constant 0 : i32
    %c0_i32_0 = arith.constant 0 : i32
    %c0_i32_1 = arith.constant 0 : i32
    return %arg0, %c0_i32, %arg1, %c0_i32_0 : i32, i32, i32, i32
  }
  func.func @transform_1(%arg0: i32, %arg1: i32) -> (i32, i32, i32) {
    %c0_i32 = arith.constant 0 : i32
    %c0_i32_0 = arith.constant 0 : i32
    return %arg0, %arg1, %c0_i32 : i32, i32, i32
  }
  func.func @transform_2(%arg0: i32, %arg1: i32) -> (i32, i32, i32) {
    %c0_i32 = arith.constant 0 : i32
    %c0_i32_0 = arith.constant 0 : i32
    return %arg0, %arg1, %c0_i32 : i32, i32, i32
  }
  func.func @transform_3(%arg0: i32, %arg1: i32) -> (i32, i32, i32) {
    %c0_i32 = arith.constant 0 : i32
    %c0_i32_0 = arith.constant 0 : i32
    return %arg0, %arg1, %c0_i32 : i32, i32, i32
  }
}

</mosaic_0001>

<bundles_post_ra>
// kernel: tpu_custom_call.1
= control target key start
LH: loop header
LB: loop body
LE: loop exit
PB: predicated region body
PF: predicated region fallthrough
CT: control target
= control target key end

     0   :  { %s1014_s0 = inlined_call_operand.hbm [shape: f32[2,4,2,128], index: 0, kind: input, shape index: {}]   ;;  %s1015_s1 = inlined_call_operand.hbm [shape: s32[2,2,128], index: 1, kind: input, shape index: {}]   ;;  %s1016_s2 = inlined_call_operand.hbm [shape: f32[2,2,128], index: 2, kind: output, shape index: {0}]   ;;  %s1017_s3 = inlined_call_operand.hbm [shape: f32[2,2,128], index: 3, kind: output, shape index: {1}]  }
   0x1   :  { %1018 = sst [smem:[#allocation14_spill]] %s1014_s0 }
   0x2   :  { %9 = vsyncpa [#allocation3], 0 }
   0x3   :  { %11 = vsyncpa [#allocation3 + $0x1], 0 }
   0x4   :  { %12 = vsyncpa [#allocation6], 0 }
   0x5   :  { %14 = vsyncpa [#allocation6 + $0x1], 0 }
   0x6   :  { %15 = vsyncpa [#allocation4], 0 }
   0x7   :  { %17 = vsyncpa [#allocation4 + $0x1], 0 }
   0x8   :  { %18 = vsyncpa [#allocation9], 0 }
   0x9   :  { %20 = vsyncpa [#allocation9 + $0x1], 0  ;;  %s795_s12 = smov 0   ;;  %s797_s13 = smov 0  }
   0xa   :  { %s799_s14 = smov 0   ;;  %s801_s15 = smov 0  }
   0xb   :  { %s803_s16 = smov 0   ;;  %s805_s17 = smov 0  }
   0xc LB: > { %s490_s18 = sadd.s32 4294967295, %s767_s17   ;;  %s491_s19 = sadd.s32 4294967294, %s767_s17   ;;  %s767_s17 = sphi %s805_s17, %s26_s17   ;;  %s763_s16 = sphi %s803_s16, %s1031_s16   ;;  %s759_s15 = sphi %s801_s15, %s1030_s15   ;;  %s755_s14 = sphi %s799_s14, %s1029_s14   ;;  %s751_s13 = sphi %s797_s13, %s1028_s13   ;;  %s747_s12 = sphi %s795_s12, %s1027_s12  }
   0xd   : > { %s38_s20 = sadd.s32 1, %s763_s16  ;;  %s47_s21 = sadd.s32 1, %s755_s14 }
   0xe   : > { %p40_p0 = scmp.ge.s32.totalorder %s38_s20, 2  ;;  %p54_p1 = scmp.ne.s32.totalorder %s755_s14, %s751_s13 }
   0xf   : > { %p55_p2 = scmp.eq.s32.totalorder %s767_s17, 0  ;;  %p60_p3 = scmp.ne.s32.totalorder %s751_s13, %s747_s12 }
  0x10   : > { %s1033_s20 = smov (%p40_p0, %s38_s20), 0  ;;  %p61_p5 = scmp.eq.s32.totalorder %s490_s18, 0 }
  0x11   : > { %p836_p4 = por %p55_p2, %p54_p1  ;;  %s42_s23 = ssub.s32 %s763_s16, %s1033_s20 }
  0x12   : > { %p114_p6 = scmp.eq.s32.totalorder %s490_s18, 1  ;;  %p45_p7 = scmp.eq.s32.totalorder %s42_s23, 0 }
  0x13   : > { %p842_p8 = por %p61_p5, %p60_p3  ;;  %p120_p10 = scmp.eq.s32.totalorder %s491_s19, 1 }
  0x14   : > { %p846_p9 = por %p114_p6, %p54_p1  ;;  %p533_p13 = scmp.lt.s32.totalorder %s767_s17, 2 }
  0x15   : > { %s851_s26 = scalar_select %p45_p7, %s755_s14, %s47_s21  }
  0x16   : > { %p853_p11 = por %p120_p10, %p60_p3  ;;  %s860_s28 = sand.u32 1, %s755_s14  }
  0x17   : > { %s494_s29 = sshll.u32 %s860_s28, 3  ;;  %s510_s30 = sshll.u32 %s763_s16, 7 }
  0x18   : > { %s1023_s0 = sld [smem:[#allocation14_spill]]  ;;  %s172_s7 = scalar_lea.vmem [#allocation2], %s494_s29 }
  0x19   : > { %s180_s8 = sshll.u32 %s172_s7, 4  ;;  %p869_p0 = pnand %p533_p13, %p836_p4  ;;  %s181_s8 = int_to_ptr.vmem [resolvable:$true] %s180_s8 }
  0x1a   : > { %p499_p1 = scmp.ge.s32.totalorder %s767_s17, 1  ;;  %s169_s10 = scalar_lea.sflag [#allocation3], %s860_s28 }
  0x1b   : > { %p599_p2 = pneg %p869_p0  ;;  %s610_s11 = scalar_lea.vmem %s181_s8, 128 }
  0x1c   : > { %p611_p3 = scmp.ne.s32.totalorder %s181_s8, %s610_s11  ;;  %s769_s18 = smov [#allocation2]  }
  0x1d   : > { %s615_s19 = sshll.u32 %s769_s18, 4  ;;  %s616_s19 = int_to_ptr.vmem [resolvable:$false] %s615_s19 }
  0x1e   : > { %s179_s6 = scalar_lea.hbm %s1023_s0, %s510_s30  ;;  %p613_p5 = pnand %p611_p3, %p599_p2 }
  0x1f   : > { %s617_s21 = scalar_lea.vmem %s616_s19, 256  ;;  %p618_p4 = scmp.lt.s32.totalorder %s181_s8, %s616_s19 }
  0x20   : > { %p614_p6 = pneg %p613_p5  ;;  %p619_p7 = scmp.lt.s32.totalorder %s617_s21, %s610_s11 }
  0x22   : > { %p620_p10 = por %p619_p7, %p618_p4 }
  0x24   : > { %p621_p13 = pnand %p620_p10, %p614_p6 }
  0x26   : > { %624 = shalt.err (!%p621_p13)
}
  0x27   : > { %s770_s22 = smov 32   ;;  %s771_s23 = smov 2  }
  0x28   : > { %522 = dma.hbm_to_vmem [thread:$0]  (!%p869_p0), %s179_s6, 128, %s181_s8, %s169_s10, %s770_s22, %s770_s22, %s771_s23  }
  0x29   : > { %p207_p3 = scmp.lt.s32.totalorder %s767_s17, 3  ;;  %s497_s29 = sshll.u32 %s860_s28, 1 }
  0x2a   : > { %s498_s30 = sshll.u32 %s763_s16, 5  ;;  %s194_s18 = scalar_lea.vmem [#allocation5], %s497_s29 }
  0x2b   : > { %p887_p5 = pnand %p499_p1, %p207_p3  ;;  %s200_s11 = scalar_lea.hbm %s1015_s1, %s498_s30 }
  0x2c   : > { %s202_s19 = sshll.u32 %s194_s18, 4  ;;  %s191_s21 = scalar_lea.sflag [#allocation6], %s860_s28  ;;  %s203_s19 = int_to_ptr.vmem [resolvable:$true] %s202_s19 }
  0x2d   : > { %s638_s0 = scalar_lea.vmem %s203_s19, 32  ;;  %s772_s6 = smov [#allocation5]  }
  0x2e   : > { %p639_p6 = scmp.ne.s32.totalorder %s203_s19, %s638_s0  ;;  %s643_s8 = sshll.u32 %s772_s6, 4  ;;  %s644_s8 = int_to_ptr.vmem [resolvable:$false] %s643_s8 }
  0x2f   : > { %s645_s10 = scalar_lea.vmem %s644_s8, 64  ;;  %p646_p1 = scmp.lt.s32.totalorder %s203_s19, %s644_s8 }
  0x30   : > { %p641_p4 = pnand %p639_p6, %p599_p2  ;;  %p647_p10 = scmp.lt.s32.totalorder %s645_s10, %s638_s0 }
  0x32   : > { %p642_p7 = pneg %p641_p4  ;;  %p648_p13 = por %p647_p10, %p646_p1 }
  0x34   : > { %p649_p3 = pnand %p648_p13, %p642_p7 }
  0x36   : > { %652 = shalt.err (!%p649_p3)
}
  0x37   : > { %525 = dma.hbm_to_vmem [thread:$0]  (!%p869_p0), %s200_s11, 32, %s203_s19, %s191_s21  }
  0x38   : > { %211 = sbr.rel (%p887_p5) target bundleno = 158 (0x9e), region = 28  ;;  %s903_s28 = sand.u32 (!%p887_p5), 1, %s751_s13  }
  0x39   : > { %s500_s22 = sshll.u32 (!%p887_p5), %s903_s28, 3  ;;  %s214_s23 = scalar_lea.sflag (!%p887_p5), [#allocation3], %s903_s28 }
  0x3a   : > { %s217_s29 = scalar_lea.vmem (!%p887_p5), [#allocation2], %s500_s22 }
  0x3d   : > { %730 = dma.done.wait (%p842_p8), %s214_s23, 128  }
  0x3e   : > { %732 = vsyncadd (%p842_p8), %s214_s23, 4294967168  ;;  %s912_s0 = sshll.u32 %s903_s28, 1  ;;  %s223_s9 = scalar_lea.sflag [#allocation6], %s903_s28 }
  0x3f   : > { %s226_s30 = scalar_lea.vmem [#allocation5], %s912_s0 }
  0x40   : > { %734 = dma.done.wait (%p842_p8), %s223_s9, 32  }
  0x41   : > { %736 = vsyncadd (%p842_p8), %s223_s9, 4294967264  ;;  %vm266_vm0 = vcmask 1041408   ;;  %v259_v0 = vld [vmem:[%s217_s29] sm:$0x3]  ;;  %v260_v1 = vld [vmem:[%s217_s29 + $0x2] sm:$0x3] }
  0x42   : > { %v261_v2 = vld [vmem:[%s217_s29 + $0x4] sm:$0x3]  ;;  %v262_v3 = vld [vmem:[%s217_s29 + $0x6] sm:$0x3]  ;;  %v267_v4 = vsel %vm266_vm0, %v259_v0, -inf  ;;  %v268_v5 = vsel %vm266_vm0, %v260_v1, -inf }
  0x43   : > { %v269_v6 = vsel %vm266_vm0, %v261_v2, -inf  ;;  %v270_v7 = vsel %vm266_vm0, %v262_v3, -inf  ;;  %v271_v8 = vmax.f32 %v267_v4, %v268_v5  ;;  %v924_v19 = vld [vmem:[%s226_s30] sm:$0x3]  ;;  %s258_s24 = scalar_lea.vmem [#allocation8], %s912_s0  ;;  %s506_s5 = sshll.u32 %s759_s15, 5 }
  0x44   : > { %v272_v9 = vmax.f32 %v269_v6, %v270_v7  ;;  %vm264_vm1 = vcmp.eq.s32.totalorder %v924_v19, 255  ;;  %s352_s4 = sshll.u32 %s258_s24, 4  ;;  %s350_s18 = scalar_lea.hbm %s1017_s3, %s506_s5  ;;  %s940_s4 = int_to_ptr.vmem [resolvable:$true] %s352_s4 }
  0x45   : > { %v265_v26 = vsel %vm264_vm1, 0, %v924_v19  ;;  %s324_s19 = scalar_lea.sflag [#allocation9], %s903_s28  ;;  %s653_s21 = scalar_lea.vmem %s940_s4, 32 }
  0x46   : > { %v273_v10 = vmax.f32 %v271_v8, %v272_v9  ;;  %vm296_vm2 = vcmp.eq.s32.totalorder %v265_v26, 0  ;;  %vm297_vm3 = vcmp.eq.s32.totalorder %v265_v26, 1  ;;  %vm298_vm4 = vcmp.eq.s32.totalorder %v265_v26, 2  ;;  %p654_p8 = scmp.ne.s32.totalorder %s940_s4, %s653_s21  ;;  %s773_s6 = smov [#allocation8]  }
  0x47   : > { %v300_v32 = vsel %vm296_vm2, %v259_v0, 0.0  ;;  %v301_v33 = vsel %vm297_vm3, %v260_v1, 0.0  ;;  %v302_v36 = vsel %vm298_vm4, %v261_v2, 0.0  ;;  %vm299_vm5 = vcmp.eq.s32.totalorder %v265_v26, 3  ;;  %s657_s8 = sshll.u32 %s773_s6, 4  ;;  %s658_s8 = int_to_ptr.vmem [resolvable:$false] %s657_s8 }
  0x48   : > { %v274_v11 = vsub.f32 %v259_v0, %v273_v10  ;;  %v275_v12 = vsub.f32 %v260_v1, %v273_v10  ;;  %v276_v13 = vsub.f32 %v261_v2, %v273_v10  ;;  %v277_v14 = vsub.f32 %v262_v3, %v273_v10  ;;  %p655_p0 = pnand %p654_p8, %p846_p9  ;;  %s659_s10 = scalar_lea.vmem %s658_s8, 64 }
  0x49   : > { %v304_v34 = vsel %vm266_vm0, %v300_v32, 0.0  ;;  %v305_v35 = vsel %vm266_vm0, %v301_v33, 0.0  ;;  %v307_v38 = vsel %vm266_vm0, %v302_v36, 0.0  ;;  %v303_v39 = vsel %vm299_vm5, %v262_v3, 0.0  ;;  %p660_p5 = scmp.lt.s32.totalorder %s940_s4, %s658_s8  ;;  %p661_p6 = scmp.lt.s32.totalorder %s659_s10, %s653_s21 }
  0x4a   : > { %v278_v15 = vmul.f32 1.442695, %v274_v11  ;;  %v280_v16 = vmul.f32 1.442695, %v275_v12  ;;  %v282_v17 = vmul.f32 1.442695, %v276_v13  ;;  %v306_v37 = vadd.f32 %v305_v35, %v304_v34  ;;  %p656_p2 = pneg %p655_p0 }
  0x4b   : > { %v284_v18 = vmul.f32 1.442695, %v277_v14  ;;  %v309_v41 = vsel %vm266_vm0, %v303_v39, 0.0  ;;  %p662_p4 = por %p661_p6, %p660_p5 }
  0x4c   : > { %585 = vpow2.f32 %v278_v15  ;;  %v308_v40 = vadd.f32 %v307_v38, %v306_v37 }
  0x4d   : > { %587 = vpow2.f32 %v280_v16  ;;  %p663_p7 = pnand %p662_p4, %p656_p2 }
  0x4e   : > { %589 = vpow2.f32 %v282_v17  ;;  %v310_v44 = vadd.f32 %v309_v41, %v308_v40 }
  0x4f   : > { %591 = vpow2.f32 %v284_v18 }
  0x59   : > { %v586_v20 = vpop.eup %585 }
  0x5a   : > { %v588_v21 = vpop.eup %587  ;;  %v286_v22 = vsel %vm266_vm0, %v586_v20, 0.0 }
  0x5b   : > { %v590_v23 = vpop.eup %589  ;;  %v287_v24 = vsel %vm266_vm0, %v588_v21, 0.0 }
  0x5c   : > { %v592_v25 = vpop.eup %591  ;;  %v288_v27 = vadd.f32 %v287_v24, %v286_v22  ;;  %v289_v28 = vsel %vm266_vm0, %v590_v23, 0.0 }
  0x5d   : > { %v291_v29 = vsel %vm266_vm0, %v592_v25, 0.0 }
  0x5e   : > { %v290_v30 = vadd.f32 %v289_v28, %v288_v27 }
  0x60   : > { %v292_v31 = vadd.f32 %v291_v29, %v290_v30 }
  0x62   : > { %593 = vlog2.f32 %v292_v31 }
  0x6f   : > { %v594_v42 = vpop.eup %593 }
  0x70   : > { %v294_v43 = vmul.f32 0.6931472, %v594_v42 }
  0x72   : > { %v295_v45 = vadd.f32 %v294_v43, %v273_v10 }
  0x74   : > { %v311_v46 = vsub.f32 %v310_v44, %v295_v45  ;;  %v316_v47 = vsub.f32 %v295_v45, %v310_v44 }
  0x76   : > { %v312_v48 = vmul.f32 1.442695, %v311_v46  ;;  %317 = vst [vmem:[%s258_s24] sm:$0x3] %v316_v47 }
  0x77   : > { %666 = shalt.err (!%p663_p7)
}
  0x78   : > { %s667_s22 = scalar_lea.hbm %s350_s18, 32  ;;  %s671_s9 = scalar_lea.hbm %s1017_s3, 64 }
  0x79   : > { %p668_p1 = scmp.ne.s32.totalorder %s350_s18, %s667_s22  ;;  %p672_p3 = scmp.lt.s32.totalorder %s350_s18, %s1017_s3 }
  0x7a   : > { %p673_p8 = scmp.lt.s32.totalorder %s671_s9, %s667_s22 }
  0x7b   : > { %p669_p10 = pnand %p668_p1, %p846_p9 }
  0x7c   : > { %p674_p0 = por %p673_p8, %p672_p3 }
  0x7d   : > { %p670_p13 = pneg %p669_p10 }
  0x7f   : > { %p675_p12 = pnand %p674_p0, %p670_p13 }
  0x81   : > { %678 = shalt.err (!%p675_p12)
}
  0x82   : > { %516 = dma.vmem_to_hbm [thread:$0]  (%p846_p9), %s940_s4, 32, %s350_s18, %s324_s19   ;;  %595 = vpow2.f32 %v312_v48 }
  0x83   : > { %s251_s7 = scalar_lea.vmem [#allocation7], %s912_s0  ;;  %s336_s8 = scalar_lea.hbm %s1016_s2, %s506_s5 }
  0x84   : > { %s338_s11 = sshll.u32 %s251_s7, 4  ;;  %s319_s10 = scalar_lea.sflag [#allocation4], %s903_s28  ;;  %s965_s11 = int_to_ptr.vmem [resolvable:$true] %s338_s11 }
  0x85   : > { %s679_s4 = scalar_lea.vmem %s965_s11, 32  ;;  %s774_s0 = smov [#allocation7]  }
  0x86   : > { %p680_p12 = scmp.ne.s32.totalorder %s965_s11, %s679_s4  ;;  %s683_s18 = sshll.u32 %s774_s0, 4  ;;  %s684_s18 = int_to_ptr.vmem [resolvable:$false] %s683_s18 }
  0x87   : > { %s685_s19 = scalar_lea.vmem %s684_s18, 64  ;;  %p686_p6 = scmp.lt.s32.totalorder %s965_s11, %s684_s18 }
  0x88   : > { %p681_p2 = pnand %p680_p12, %p846_p9  ;;  %p687_p4 = scmp.lt.s32.totalorder %s685_s19, %s679_s4 }
  0x8a   : > { %p682_p5 = pneg %p681_p2  ;;  %p688_p7 = por %p687_p4, %p686_p6 }
  0x8c   : > { %p689_p1 = pnand %p688_p7, %p682_p5 }
  0x8f   : > { %v596_v49 = vpop.eup %595 }
  0x90   : > { %v314_v50 = vsel %vm264_vm1, 1.0, %v596_v49 }
  0x91   : > { %315 = vst [vmem:[%s251_s7] sm:$0x3] %v314_v50 }
  0x92   : > { %692 = shalt.err (!%p689_p1)
}
  0x93   : > { %s693_s15 = scalar_lea.hbm %s336_s8, 32  ;;  %s697_s22 = scalar_lea.hbm %s1016_s2, 64 }
  0x94   : > { %p694_p10 = scmp.ne.s32.totalorder %s336_s8, %s693_s15  ;;  %p698_p8 = scmp.lt.s32.totalorder %s336_s8, %s1016_s2 }
  0x95   : > { %p699_p0 = scmp.lt.s32.totalorder %s697_s22, %s693_s15 }
  0x96   : > { %p695_p13 = pnand %p694_p10, %p846_p9 }
  0x97   : > { %p700_p12 = por %p699_p0, %p698_p8 }
  0x98   : > { %p696_p3 = pneg %p695_p13 }
  0x9a   : > { %p701_p2 = pnand %p700_p12, %p696_p3 }
  0x9c   : > { %704 = shalt.err (!%p701_p2)
}
  0x9d   : > { %515 = dma.vmem_to_hbm [thread:$0]  (%p846_p9), %s965_s11, 32, %s336_s8, %s319_s10  }
  0x9e PF: > { %s364_s9 = sand.u32 1, %s747_s12   ;;  %p1026_p5 = scmp.ge.s32.totalorder %s767_s17, 2 }
  0x9f   : > { %s365_s30 = scalar_lea.sflag [#allocation4], %s364_s9 }
  0xa0   : > { %p527_p6 = pnand %p1026_p5, %p853_p11 }
  0xa2   : > { %p528_p4 = pneg %p527_p6 }
  0xa4   : > { %738 = dma.done.wait (%p528_p4), %s365_s30, 32  }
  0xa5   : > { %740 = vsyncadd (%p528_p4), %s365_s30, 4294967264  ;;  %s374_s24 = scalar_lea.sflag [#allocation9], %s364_s9 }
  0xa6   : > { %742 = dma.done.wait (%p528_p4), %s374_s24, 32  }
  0xa7   : > { %744 = vsyncadd (%p528_p4), %s374_s24, 4294967264  ;;  %s26_s17 = sadd.s32 1, %s767_s17   ;;  %s1027_s12 = smov %s751_s13 }
  0xa8   : > { %p23_p7 = scmp.ge.s32.totalorder %s26_s17, 4   ;;  %s1028_s13 = smov %s755_s14 }
  0xa9   : > { %s1029_s14 = smov %s851_s26  ;;  %s1030_s15 = smov %s763_s16 }
  0xaa   : > { %s1031_s16 = smov %s1033_s20  ;;  %25 = sbr.rel (!%p23_p7) target bundleno = 12 (0xc), region = 103 }
  0xaf   :  { %379 = vsyncpa [#allocation3], 1 }
  0xb0   :  { %381 = vsyncpa [#allocation3 + $0x1], 1 }
  0xb1   :  { %382 = vsyncpa [#allocation6], 1 }
  0xb2   :  { %384 = vsyncpa [#allocation6 + $0x1], 1 }
  0xb3   :  { %385 = vsyncpa [#allocation4], 1 }
  0xb4   :  { %387 = vsyncpa [#allocation4 + $0x1], 1 }
  0xb5   :  { %388 = vsyncpa [#allocation9], 1 }
  0xb6   :  { %390 = vsyncpa [#allocation9 + $0x1], 1 }

</bundles_post_ra>
